<compile_context>
chip_gen: v7x
topology: tpu7x:2x2x1
jax: 0.10.0
libtpu: 0.0.40
codegen_flags: <defaults>
</compile_context>

<pallas_src>
import jax
import jax.numpy as jnp
from jax.experimental import pallas as pl
from jax.experimental.pallas import tpu as pltpu


def _self_attn_kernel(x_ref, wqT_ref, wkT_ref, wvT_ref, attn_ref, out_ref):
    Bt, N, D = x_ref.shape
    cdt = x_ref.dtype                      # compute dtype (operands pre-cast in wrapper)

    # Stack batch rows -> (Bt*N, D): one fat-M MXU pass per projection.
    xm = x_ref[...].reshape(Bt * N, D)

    # Linear(bias=False): y = x @ W^T.  W^T is precomputed in the wrapper (and the
    # softmax scale is already folded into Wq^T), so no in-kernel transpose / scaling.
    q = jnp.dot(xm, wqT_ref[...], preferred_element_type=jnp.float32)
    k = jnp.dot(xm, wkT_ref[...], preferred_element_type=jnp.float32)
    v = jnp.dot(xm, wvT_ref[...], preferred_element_type=jnp.float32)
    q = q.reshape(Bt, N, D).astype(cdt)
    k = k.reshape(Bt, N, D).astype(cdt)
    v = v.reshape(Bt, N, D).astype(cdt)

    # logits[b] = q[b] @ k[b]^T — contract on D directly (no materialized transpose).
    logits = jnp.einsum("bnd,bmd->bnm", q, k, preferred_element_type=jnp.float32)

    # Numerically stable softmax, kept in f32.
    m = jnp.max(logits, axis=-1, keepdims=True)
    p = jnp.exp(logits - m)
    attn = p * pl.reciprocal(jnp.sum(p, axis=-1, keepdims=True), approx=False)

    out = jnp.einsum("bnm,bmd->bnd", attn.astype(cdt), v,
                     preferred_element_type=jnp.float32)

    attn_ref[...] = attn.astype(attn_ref.dtype)
    out_ref[...] = out.astype(out_ref.dtype)


def _choose_batch_tile(B, N, D, itemsize, vmem_budget_bytes=24 * 1024 * 1024):
    """Largest divisor of B whose per-step working set fits the VMEM budget
    (targets Bt*N >= 512 MXU rows when possible)."""
    best = 1
    for bt in range(1, B + 1):
        if B % bt:
            continue
        per_step = (
            2 * bt * N * D * itemsize            # x block (double-buffered)
            + 2 * 3 * D * D * itemsize           # weights (double-buffered)
            + 2 * bt * N * N * 4                 # attn out block (double-buffered)
            + 2 * bt * N * D * 4                 # out block (double-buffered)
            + bt * (3 * N * D + 2 * N * N) * 4   # q/k/v/logits/p f32 intermediates
        )
        if per_step > vmem_budget_bytes:
            break
        best = bt
        if bt * N >= 512:
            break
    return best


def self_attention(x, wq, wk, wv, *, compute_dtype=jnp.float32):
    """x: (B, N, D) f32.  wq/wk/wv: (D, D) PyTorch-style (out_features, in_features).

    compute_dtype=jnp.bfloat16 runs the four matmuls with bf16 operands and f32
    accumulation (fast MXU path on v6e/v7x); softmax and outputs stay f32.
    """
    B, N, D = x.shape
    scale = float(D) ** (-0.5)

    # One-time relayout / folding outside the kernel (plain XLA ops, off the hot loop):
    x_in = x.astype(compute_dtype)
    wq_t = (wq.T * scale).astype(compute_dtype)   # fold softmax scale into Wq^T
    wk_t = wk.T.astype(compute_dtype)
    wv_t = wv.T.astype(compute_dtype)

    itemsize = jnp.dtype(compute_dtype).itemsize
    bt = _choose_batch_tile(B, N, D, itemsize)

    flops = 2 * B * (3 * N * D * D + 2 * N * N * D)
    bytes_accessed = (B * N * D * itemsize + 3 * D * D * itemsize
                      + B * N * N * 4 + B * N * D * 4)
    cost = pl.CostEstimate(flops=flops, transcendentals=B * N * N,
                           bytes_accessed=bytes_accessed)

    # TODO(synk): for very large N (e.g. >= 2048 on v7x's 64 MiB VMEM) add a
    # query-tile grid axis and an explicit vmem_limit_bytes; not needed at these shapes.
    attn3, out = pl.pallas_call(
        _self_attn_kernel,
        out_shape=(
            jax.ShapeDtypeStruct((B, N, N), jnp.float32),   # attn (unsqueezed below)
            jax.ShapeDtypeStruct((B, N, D), jnp.float32),   # attn @ v
        ),
        grid_spec=pltpu.PrefetchScalarGridSpec(
            num_scalar_prefetch=0,
            grid=(B // bt,),
            in_specs=[
                pl.BlockSpec((bt, N, D), lambda b: (b, 0, 0)),   # x, bt batches per step
                pl.BlockSpec((D, D), lambda b: (0, 0)),          # Wq^T * scale (resident)
                pl.BlockSpec((D, D), lambda b: (0, 0)),          # Wk^T
                pl.BlockSpec((D, D), lambda b: (0, 0)),          # Wv^T
            ],
            out_specs=[
                # For N >= 128 the last dim is lane-dense -> unmasked stores.
                pl.BlockSpec((bt, N, N), lambda b: (b, 0, 0)),
                pl.BlockSpec((bt, N, D), lambda b: (b, 0, 0)),
            ],
        ),
        compiler_params=pltpu.CompilerParams(
            dimension_semantics=("parallel",),
        ),
        cost_estimate=cost,
    )(x_in, wq_t, wk_t, wv_t)

    # attn.unsqueeze(1) — free metadata reshape outside the kernel.
    return attn3[:, None, :, :], out


def _reference(x, wq, wk, wv):
    D = x.shape[-1]
    scale = float(D) ** (-0.5)
    q = jnp.einsum("bnd,ed->bne", x, wq)
    k = jnp.einsum("bnd,ed->bne", x, wk)
    v = jnp.einsum("bnd,ed->bne", x, wv)
    attn = jax.nn.softmax(jnp.einsum("bnd,bmd->bnm", q, k) * scale, axis=-1)
    out = jnp.einsum("bnm,bmd->bnd", attn, v)
    return attn[:, None, :, :], out


if __name__ == "__main__":
    # Small shapes consistent with the module's sequence input (B, N, dim).
    B, N, D = 2, 8, 128

    key = jax.random.PRNGKey(0)
    kx, kq, kk, kv = jax.random.split(key, 4)

    x = jax.random.normal(kx, (B, N, D), dtype=jnp.float32)
    # Deterministic synthetic weights (PyTorch Linear weight shape: (out, in)).
    bound = 1.0 / (D ** 0.5)
    wq = jax.random.uniform(kq, (D, D), jnp.float32, -bound, bound)
    wk = jax.random.uniform(kk, (D, D), jnp.float32, -bound, bound)
    wv = jax.random.uniform(kv, (D, D), jnp.float32, -bound, bound)

    attn_ref, out_ref = _reference(x, wq, wk, wv)

    # f32 operands (strict tolerances).
    attn, out = self_attention(x, wq, wk, wv)
    jax.block_until_ready((attn, out))
    assert attn.shape == (B, 1, N, N) and out.shape == (B, N, D)
    assert jnp.allclose(attn, attn_ref, atol=1e-5, rtol=1e-5), "attn mismatch (f32)"
    assert jnp.allclose(out, out_ref, atol=1e-4, rtol=1e-4), "output mismatch (f32)"

    # bf16 operands / f32 accumulation (fast MXU path on v6e/v7x), relaxed tolerances.
    attn_bf, out_bf = self_attention(x, wq, wk, wv, compute_dtype=jnp.bfloat16)
    jax.block_until_ready((attn_bf, out_bf))
    assert jnp.allclose(attn_bf, attn_ref, atol=5e-2, rtol=5e-2), "attn mismatch (bf16)"
    assert jnp.allclose(out_bf, out_ref, atol=5e-2, rtol=5e-2), "output mismatch (bf16)"

    print("KERNEL_OK")
</pallas_src>

<mosaic_0001>
module attributes {stable_mosaic.version = 11 : i64} {
  func.func @_self_attn_kernel(%arg0: i32, %arg1: memref<2x8x128xf32, #tpu.memory_space<vmem>>, %arg2: memref<128x128xf32, #tpu.memory_space<vmem>>, %arg3: memref<128x128xf32, #tpu.memory_space<vmem>>, %arg4: memref<128x128xf32, #tpu.memory_space<vmem>>, %arg5: memref<2x8x8xf32, #tpu.memory_space<vmem>>, %arg6: memref<2x8x128xf32, #tpu.memory_space<vmem>>) attributes {dimension_semantics = [#tpu.dimension_semantics<parallel>], iteration_bounds = array<i64: 1>, scalar_prefetch = 0 : i64, scratch_operands = 0 : i64, tpu.core_type = #tpu.core_type<tc>, window_params = [{transform_indices = @transform_0, window_bounds = array<i64: 2, 8, 128>}, {pipeline_mode = #tpu.pipeline_mode<synchronous>, transform_indices = @transform_1, window_bounds = array<i64: 128, 128>}, {pipeline_mode = #tpu.pipeline_mode<synchronous>, transform_indices = @transform_2, window_bounds = array<i64: 128, 128>}, {pipeline_mode = #tpu.pipeline_mode<synchronous>, transform_indices = @transform_3, window_bounds = array<i64: 128, 128>}, {transform_indices = @transform_4, window_bounds = array<i64: 2, 8, 8>}, {transform_indices = @transform_5, window_bounds = array<i64: 2, 8, 128>}]} {
    %c0 = arith.constant 0 : index
    %c0_0 = arith.constant 0 : index
    %c0_1 = arith.constant 0 : index
    %0 = vector.load %arg1[%c0, %c0_0, %c0_1] : memref<2x8x128xf32, #tpu.memory_space<vmem>>, vector<2x8x128xf32>
    %1 = vector.shape_cast %0 : vector<2x8x128xf32> to vector<16x128xf32>
    %c0_2 = arith.constant 0 : index
    %c0_3 = arith.constant 0 : index
    %2 = vector.load %arg2[%c0_2, %c0_3] : memref<128x128xf32, #tpu.memory_space<vmem>>, vector<128x128xf32>
    %cst = arith.constant dense<0.000000e+00> : vector<16x128xf32>
    %3 = tpu.matmul %1, %2, %cst {dimension_numbers = #tpu.dot_dimension_numbers<[1], [0], [0], [1], [0, 0, 1, 1], [], []>} : vector<16x128xf32>, vector<128x128xf32>, vector<16x128xf32> -> vector<16x128xf32>
    %c0_4 = arith.constant 0 : index
    %c0_5 = arith.constant 0 : index
    %4 = vector.load %arg3[%c0_4, %c0_5] : memref<128x128xf32, #tpu.memory_space<vmem>>, vector<128x128xf32>
    %cst_6 = arith.constant dense<0.000000e+00> : vector<16x128xf32>
    %5 = tpu.matmul %1, %4, %cst_6 {dimension_numbers = #tpu.dot_dimension_numbers<[1], [0], [0], [1], [0, 0, 1, 1], [], []>} : vector<16x128xf32>, vector<128x128xf32>, vector<16x128xf32> -> vector<16x128xf32>
    %c0_7 = arith.constant 0 : index
    %c0_8 = arith.constant 0 : index
    %6 = vector.load %arg4[%c0_7, %c0_8] : memref<128x128xf32, #tpu.memory_space<vmem>>, vector<128x128xf32>
    %cst_9 = arith.constant dense<0.000000e+00> : vector<16x128xf32>
    %7 = tpu.matmul %1, %6, %cst_9 {dimension_numbers = #tpu.dot_dimension_numbers<[1], [0], [0], [1], [0, 0, 1, 1], [], []>} : vector<16x128xf32>, vector<128x128xf32>, vector<16x128xf32> -> vector<16x128xf32>
    %8 = vector.shape_cast %3 : vector<16x128xf32> to vector<2x8x128xf32>
    %9 = vector.shape_cast %5 : vector<16x128xf32> to vector<2x8x128xf32>
    %10 = vector.shape_cast %7 : vector<16x128xf32> to vector<2x8x128xf32>
    "tpu.trace_start"() <{level = 10 : i32, message = "bnd,bmd->bnm"}> : () -> ()
    %cst_10 = arith.constant dense<0.000000e+00> : vector<2x8x8xf32>
    %11 = tpu.matmul %8, %9, %cst_10 {dimension_numbers = #tpu.dot_dimension_numbers<[2], [2], [1], [1], [0, 0, 0, 1, 1, 1], [0], [0]>} : vector<2x8x128xf32>, vector<2x8x128xf32>, vector<2x8x8xf32> -> vector<2x8x8xf32>
    "tpu.trace_stop"() : () -> ()
    %cst_11 = arith.constant dense<0xFF800000> : vector<2x8xf32>
    %12 = vector.multi_reduction <maximumf>, %11, %cst_11 [2] : vector<2x8x8xf32> to vector<2x8xf32>
    %13 = vector.shape_cast %12 : vector<2x8xf32> to vector<2x8x1xf32>
    %14 = vector.broadcast %13 : vector<2x8x1xf32> to vector<2x8x8xf32>
    %15 = arith.subf %11, %14 : vector<2x8x8xf32>
    %16 = math.exp %15 : vector<2x8x8xf32>
    %cst_12 = arith.constant dense<0.000000e+00> : vector<2x8xf32>
    %17 = vector.multi_reduction <add>, %16, %cst_12 [2] : vector<2x8x8xf32> to vector<2x8xf32>
    %18 = vector.shape_cast %17 : vector<2x8xf32> to vector<2x8x1xf32>
    %19 = tpu.reciprocal %18 : vector<2x8x1xf32> -> vector<2x8x1xf32>
    %20 = vector.broadcast %19 : vector<2x8x1xf32> to vector<2x8x8xf32>
    %21 = arith.mulf %16, %20 : vector<2x8x8xf32>
    "tpu.trace_start"() <{level = 10 : i32, message = "bnm,bmd->bnd"}> : () -> ()
    %cst_13 = arith.constant dense<0.000000e+00> : vector<2x8x128xf32>
    %22 = tpu.matmul %21, %10, %cst_13 {dimension_numbers = #tpu.dot_dimension_numbers<[2], [1], [1], [2], [0, 0, 0, 1, 1, 2], [0], [0]>} : vector<2x8x8xf32>, vector<2x8x128xf32>, vector<2x8x128xf32> -> vector<2x8x128xf32>
    "tpu.trace_stop"() : () -> ()
    %c0_14 = arith.constant 0 : index
    %c0_15 = arith.constant 0 : index
    %c0_16 = arith.constant 0 : index
    %23 = vector.load %arg5[%c0_14, %c0_15, %c0_16] : memref<2x8x8xf32, #tpu.memory_space<vmem>>, vector<2x8x8xf32>
    tpu.vector_store %arg5[%c0_14, %c0_15, %c0_16], %21 {strides = array<i32>} : memref<2x8x8xf32, #tpu.memory_space<vmem>>, vector<2x8x8xf32>,
    %c0_17 = arith.constant 0 : index
    %c0_18 = arith.constant 0 : index
    %c0_19 = arith.constant 0 : index
    %24 = vector.load %arg6[%c0_17, %c0_18, %c0_19] : memref<2x8x128xf32, #tpu.memory_space<vmem>>, vector<2x8x128xf32>
    tpu.vector_store %arg6[%c0_17, %c0_18, %c0_19], %22 {strides = array<i32>} : memref<2x8x128xf32, #tpu.memory_space<vmem>>, vector<2x8x128xf32>,
    return
  }
  func.func @transform_0(%arg0: i32) -> (i32, i32, i32) {
    %c0_i32 = arith.constant 0 : i32
    %c0_i32_0 = arith.constant 0 : i32
    %c0_i32_1 = arith.constant 0 : i32
    return %arg0, %c0_i32, %c0_i32_0 : i32, i32, i32
  }
  func.func @transform_1(%arg0: i32) -> (i32, i32) {
    %c0_i32 = arith.constant 0 : i32
    %c0_i32_0 = arith.constant 0 : i32
    %c0_i32_1 = arith.constant 0 : i32
    return %c0_i32, %c0_i32_0 : i32, i32
  }
  func.func @transform_2(%arg0: i32) -> (i32, i32) {
    %c0_i32 = arith.constant 0 : i32
    %c0_i32_0 = arith.constant 0 : i32
    %c0_i32_1 = arith.constant 0 : i32
    return %c0_i32, %c0_i32_0 : i32, i32
  }
  func.func @transform_3(%arg0: i32) -> (i32, i32) {
    %c0_i32 = arith.constant 0 : i32
    %c0_i32_0 = arith.constant 0 : i32
    %c0_i32_1 = arith.constant 0 : i32
    return %c0_i32, %c0_i32_0 : i32, i32
  }
  func.func @transform_4(%arg0: i32) -> (i32, i32, i32) {
    %c0_i32 = arith.constant 0 : i32
    %c0_i32_0 = arith.constant 0 : i32
    %c0_i32_1 = arith.constant 0 : i32
    return %arg0, %c0_i32, %c0_i32_0 : i32, i32, i32
  }
  func.func @transform_5(%arg0: i32) -> (i32, i32, i32) {
    %c0_i32 = arith.constant 0 : i32
    %c0_i32_0 = arith.constant 0 : i32
    %c0_i32_1 = arith.constant 0 : i32
    return %arg0, %c0_i32, %c0_i32_0 : i32, i32, i32
  }
}

</mosaic_0001>

<bundles_post_ra>
// kernel: tpu_custom_call.1
= control target key start
LH: loop header
LB: loop body
LE: loop exit
PB: predicated region body
PF: predicated region fallthrough
CT: control target
= control target key end

     0   :  { %11 = vsyncpa [#allocation3], 0  ;;  %s1308_s0 = inlined_call_operand.hbm [shape: f32[2,8,128], index: 0, kind: input, shape index: {}]   ;;  %s1309_s1 = inlined_call_operand.hbm [shape: f32[128,128], index: 1, kind: input, shape index: {}]   ;;  %s1310_s2 = inlined_call_operand.hbm [shape: f32[128,128], index: 2, kind: input, shape index: {}]   ;;  %s1311_s3 = inlined_call_operand.hbm [shape: f32[128,128], index: 3, kind: input, shape index: {}]   ;;  %s1312_s4 = inlined_call_operand.hbm [shape: f32[2,8,8], index: 4, kind: output, shape index: {0}]   ;;  %s1313_s5 = inlined_call_operand.hbm [shape: f32[2,8,128], index: 5, kind: output, shape index: {1}]  }
   0x1   :  { %12 = vsyncpa [#allocation6], 0 }
   0x2   :  { %13 = vsyncpa [#allocation9], 0 }
   0x3   :  { %14 = vsyncpa [#allocation4], 0 }
   0x4   :  { %15 = vsyncpa [#allocation12], 0  ;;  %s1144_s18 = smov [#allocation5]   ;;  %s1145_s20 = smov [#allocation2]  }
   0x5   :  { %s33_s19 = sshll.u32 %s1144_s18, 4  ;;  %s21_s21 = sshll.u32 %s1145_s20, 4  ;;  %s34_s19 = int_to_ptr.vmem [resolvable:$true] %s33_s19  ;;  %s1184_s21 = int_to_ptr.vmem [resolvable:$true] %s21_s21 }
   0x6   :  { %s1002_s24 = scalar_lea.hbm %s1309_s1, 2048 }
   0x7   :  { %p1003_p0 = scmp.ne.s32.totalorder %s1309_s1, %s1002_s24  ;;  %p1006_p1 = scmp.lt.u32.totalorder %s1002_s24, %s1309_s1 }
   0x9   :  { %p1008_p2 = pnand %p1006_p1, %p1003_p0 }
   0xb   :  { %1011 = shalt.err (!%p1008_p2)
}
   0xc   :  { %s1012_s29 = scalar_lea.vmem %s34_s19, 2048  ;;  %p1017_p4 = scmp.lt.s32.totalorder %s34_s19, %s34_s19 }
   0xd   :  { %p1013_p3 = scmp.ne.s32.totalorder %s34_s19, %s1012_s29  ;;  %p1018_p5 = scmp.lt.s32.totalorder %s1012_s29, %s1012_s29 }
   0xf   :  { %p1019_p6 = por %p1018_p5, %p1017_p4 }
  0x11   :  { %p1020_p7 = pnand %p1019_p6, %p1013_p3 }
  0x13   :  { %1023 = shalt.err (!%p1020_p7)
}
  0x14   :  { %s1146_s30 = smov 128   ;;  %s1147_s6 = smov 8  }
  0x15   :  { %39 = dma.hbm_to_vmem [thread:$0]  %s1309_s1, 2048, %s34_s19, [#allocation6], %s1146_s30, %s1146_s30, %s1147_s6  }
  0x16   :  { %s1024_s11 = scalar_lea.hbm %s1308_s0, 256 }
  0x17   :  { %p1025_p8 = scmp.ne.s32.totalorder %s1308_s0, %s1024_s11  ;;  %p1028_p9 = scmp.lt.u32.totalorder %s1024_s11, %s1308_s0 }
  0x19   :  { %p1030_p10 = pnand %p1028_p9, %p1025_p8 }
  0x1b   :  { %1033 = shalt.err (!%p1030_p10)
}
  0x1c   :  { %s1034_s16 = scalar_lea.vmem %s1184_s21, 256  ;;  %p1039_p12 = scmp.lt.s32.totalorder %s1184_s21, %s1184_s21 }
  0x1d   :  { %p1035_p11 = scmp.ne.s32.totalorder %s1184_s21, %s1034_s16  ;;  %p1040_p13 = scmp.lt.s32.totalorder %s1034_s16, %s1034_s16 }
  0x1f   :  { %p1041_p0 = por %p1040_p13, %p1039_p12 }
  0x21   :  { %p1042_p1 = pnand %p1041_p0, %p1035_p11 }
  0x23   :  { %1045 = shalt.err (!%p1042_p1)
}
  0x24   :  { %27 = dma.hbm_to_vmem [thread:$0]  %s1308_s0, 256, %s1184_s21, [#allocation3], %s1146_s30, %s1146_s30, %s1147_s6  }
  0x25   :  { %s1148_s18 = smov [#allocation7]   ;;  %s1149_s20 = smov [#allocation8]  }
  0x26   :  { %s45_s19 = sshll.u32 %s1148_s18, 4  ;;  %s57_s22 = sshll.u32 %s1149_s20, 4  ;;  %s46_s19 = int_to_ptr.vmem [resolvable:$true] %s45_s19  ;;  %s1221_s22 = int_to_ptr.vmem [resolvable:$true] %s57_s22 }
  0x27   :  { %s1046_s25 = scalar_lea.hbm %s1310_s2, 2048 }
  0x28   :  { %p1047_p2 = scmp.ne.s32.totalorder %s1310_s2, %s1046_s25  ;;  %p1050_p3 = scmp.lt.u32.totalorder %s1046_s25, %s1310_s2 }
  0x2a   :  { %p1052_p4 = pnand %p1050_p3, %p1047_p2 }
  0x2c   :  { %1055 = shalt.err (!%p1052_p4)
}
  0x2d   :  { %s1056_s0 = scalar_lea.vmem %s46_s19, 2048  ;;  %p1061_p6 = scmp.lt.s32.totalorder %s46_s19, %s46_s19 }
  0x2e   :  { %p1057_p5 = scmp.ne.s32.totalorder %s46_s19, %s1056_s0  ;;  %p1062_p7 = scmp.lt.s32.totalorder %s1056_s0, %s1056_s0 }
  0x30   :  { %p1063_p8 = por %p1062_p7, %p1061_p6 }
  0x32   :  { %p1064_p9 = pnand %p1063_p8, %p1057_p5 }
  0x34   :  { %1067 = shalt.err (!%p1064_p9)
}
  0x35   :  { %51 = dma.hbm_to_vmem [thread:$0]  %s1310_s2, 2048, %s46_s19, [#allocation6], %s1146_s30, %s1146_s30, %s1147_s6  }
  0x36   :  { %s1068_s10 = scalar_lea.hbm %s1311_s3, 2048 }
  0x37   :  { %p1069_p10 = scmp.ne.s32.totalorder %s1311_s3, %s1068_s10  ;;  %p1072_p11 = scmp.lt.u32.totalorder %s1068_s10, %s1311_s3 }
  0x39   :  { %p1074_p12 = pnand %p1072_p11, %p1069_p10 }
  0x3b   :  { %1077 = shalt.err (!%p1074_p12)
}
  0x3c   :  { %s1078_s15 = scalar_lea.vmem %s1221_s22, 2048  ;;  %p1083_p0 = scmp.lt.s32.totalorder %s1221_s22, %s1221_s22 }
  0x3d   :  { %p1079_p13 = scmp.ne.s32.totalorder %s1221_s22, %s1078_s15  ;;  %p1084_p1 = scmp.lt.s32.totalorder %s1078_s15, %s1078_s15 }
  0x3f   :  { %p1085_p2 = por %p1084_p1, %p1083_p0 }
  0x41   :  { %p1086_p3 = pnand %p1085_p2, %p1079_p13 }
  0x43   :  { %1089 = shalt.err (!%p1086_p3)
}
  0x44   :  { %63 = dma.hbm_to_vmem [thread:$0]  %s1311_s3, 2048, %s1221_s22, [#allocation9], %s1146_s30, %s1146_s30, %s1147_s6  }
  0x45   :  { %1134 = dma.done.wait [#allocation3], 256  }
  0x46   :  { %1135 = vsyncadd [#allocation3], 4294967040 }
  0x47   :  { %1136 = dma.done.wait [#allocation6], 4096  }
  0x48   :  { %1137 = vsyncadd [#allocation6], 4294963200 }
  0x49   :  { %1138 = dma.done.wait [#allocation9], 2048  }
  0x4a   :  { %1139 = vsyncadd [#allocation9], 4294965248  ;;  %v169_v0 = vld [vmem:[#allocation7] sm:$0xff]  ;;  %v170_v1 = vld [vmem:[#allocation7 + $0x8] sm:$0xff]  ;;  %v1150_v50 = vmov 0.0   ;;  %vm1151_vm0 = vmmov 0  }
  0x4b   :  { %v78_v2 = vld [vmem:[#allocation5] sm:$0xff]  ;;  %v920_v3 = vpack.c.bf16 %v170_v1, %v169_v0  ;;  %v79_v4 = vld [vmem:[#allocation5 + $0x8] sm:$0xff]  ;;  %v171_v5 = vld [vmem:[#allocation7 + $0x10] sm:$0xff]  ;;  %vm491_vm1 = vcmask 64512   ;;  %s1152_s3 = smov [#allocation10]  }
  0x4c   :  { %v172_v6 = vld [vmem:[#allocation7 + $0x18] sm:$0xff]  ;;  %v888_v7 = vpack.c.bf16 %v79_v4, %v78_v2  ;;  %v80_v9 = vld [vmem:[#allocation5 + $0x10] sm:$0xff]  ;;  %v173_v11 = vld [vmem:[#allocation7 + $0x20] sm:$0xff]  ;;  %s669_s1 = sshll.u32 %s1152_s3, 4  ;;  %s670_s1 = int_to_ptr.vmem [resolvable:$true] %s669_s1 }
  0x4d   :  { %v924_v8 = vpack.c.bf16 %v172_v6, %v171_v5  ;;  %v81_v10 = vld [vmem:[#allocation5 + $0x18] sm:$0xff]  ;;  %921 = vmatprep.subr.bf16.mxu1 %v920_v3  ;;  %v174_v13 = vld [vmem:[#allocation7 + $0x28] sm:$0xff]  ;;  %v82_v14 = vld [vmem:[#allocation5 + $0x20] sm:$0xff]  ;;  %s1090_s17 = scalar_lea.vmem %s670_s1, 256  ;;  %p1095_p5 = scmp.lt.s32.totalorder %s670_s1, %s670_s1 }
  0x4e   :  { %v892_v12 = vpack.c.bf16 %v81_v10, %v80_v9  ;;  %v83_v15 = vld [vmem:[#allocation5 + $0x28] sm:$0xff]  ;;  %923 = vmatpush3.bf16.msra.mxu1 %v920_v3  ;;  %889 = vmatprep.subr.bf16.mxu0 %v888_v7  ;;  %v928_v16 = vpack.c.bf16 %v174_v13, %v173_v11  ;;  %v175_v18 = vld [vmem:[#allocation7 + $0x30] sm:$0xff]  ;;  %v176_v19 = vld [vmem:[#allocation7 + $0x38] sm:$0xff]  ;;  %p1091_p4 = scmp.ne.s32.totalorder %s670_s1, %s1090_s17  ;;  %p1096_p6 = scmp.lt.s32.totalorder %s1090_s17, %s1090_s17 }
  0x4f   :  { %891 = vmatpush3.bf16.msra.mxu0 %v888_v7  ;;  %925 = vmatprep.subr.bf16.mxu1 %v924_v8  ;;  %v896_v17 = vpack.c.bf16 %v83_v15, %v82_v14  ;;  %v84_v20 = vld [vmem:[#allocation5 + $0x30] sm:$0xff]  ;;  %v85_v21 = vld [vmem:[#allocation5 + $0x38] sm:$0xff]  ;;  %v932_v22 = vpack.c.bf16 %v176_v19, %v175_v18  ;;  %v177_v24 = vld [vmem:[#allocation7 + $0x40] sm:$0xff] }
  0x50   :  { %893 = vmatprep.subr.bf16.mxu0 %v892_v12  ;;  %v900_v23 = vpack.c.bf16 %v85_v21, %v84_v20  ;;  %v178_v25 = vld [vmem:[#allocation7 + $0x48] sm:$0xff]  ;;  %v76_v26 = vld [vmem:[#allocation2] sm:$0xff]  ;;  %v86_v27 = vld [vmem:[#allocation5 + $0x40] sm:$0xff]  ;;  %p1097_p7 = por %p1096_p6, %p1095_p5 }
  0x51   :  { %v87_v28 = vld [vmem:[#allocation5 + $0x48] sm:$0xff]  ;;  %830 = vmatprep.mubr.f32.mxu1 %v76_v26  ;;  %795 = vmatprep.mubr.f32.mxu0 %v76_v26  ;;  %v936_v29 = vpack.c.bf16 %v178_v25, %v177_v24  ;;  %v179_v31 = vld [vmem:[#allocation7 + $0x50] sm:$0xff]  ;;  %v180_v32 = vld [vmem:[#allocation7 + $0x58] sm:$0xff] }
  0x52   :  { %927 = vmatpush3.bf16.msra.mxu1 %v924_v8  ;;  %v904_v30 = vpack.c.bf16 %v87_v28, %v86_v27  ;;  %v88_v33 = vld [vmem:[#allocation5 + $0x50] sm:$0xff]  ;;  %v89_v34 = vld [vmem:[#allocation5 + $0x58] sm:$0xff]  ;;  %v940_v35 = vpack.c.bf16 %v180_v32, %v179_v31  ;;  %v181_v37 = vld [vmem:[#allocation7 + $0x60] sm:$0xff]  ;;  %p1098_p8 = pnand %p1097_p7, %p1091_p4 }
  0x53   :  { %895 = vmatpush3.bf16.msra.mxu0 %v892_v12  ;;  %929 = vmatprep.subr.bf16.mxu1 %v928_v16  ;;  %v908_v36 = vpack.c.bf16 %v89_v34, %v88_v33  ;;  %v182_v38 = vld [vmem:[#allocation7 + $0x68] sm:$0xff]  ;;  %v90_v39 = vld [vmem:[#allocation5 + $0x60] sm:$0xff]  ;;  %v183_v43 = vld [vmem:[#allocation7 + $0x70] sm:$0xff] }
  0x54   :  { %897 = vmatprep.subr.bf16.mxu0 %v896_v17  ;;  %v91_v40 = vld [vmem:[#allocation5 + $0x68] sm:$0xff]  ;;  %v944_v41 = vpack.c.bf16 %v182_v38, %v181_v37  ;;  %v184_v44 = vld [vmem:[#allocation7 + $0x78] sm:$0xff]  ;;  %v92_v45 = vld [vmem:[#allocation5 + $0x70] sm:$0xff] }
  0x55   :  { %v912_v42 = vpack.c.bf16 %v91_v40, %v90_v39  ;;  %v93_v46 = vld [vmem:[#allocation5 + $0x78] sm:$0xff]  ;;  %v948_v47 = vpack.c.bf16 %v184_v44, %v183_v43  ;;  %v260_v55 = vld [vmem:[#allocation8] sm:$0xff]  ;;  %v261_v56 = vld [vmem:[#allocation8 + $0x8] sm:$0xff] }
  0x56   :  { %931 = vmatpush3.bf16.msra.mxu1 %v928_v16  ;;  %v916_v48 = vpack.c.bf16 %v93_v46, %v92_v45  ;;  %v77_v49 = vld [vmem:[#allocation2 + $0x8] sm:$0xff]  ;;  %v262_v57 = vld [vmem:[#allocation8 + $0x10] sm:$0xff]  ;;  %v952_v58 = vpack.c.bf16 %v261_v56, %v260_v55  ;;  %v264_v61 = vld [vmem:[#allocation8 + $0x20] sm:$0xff] }
  0x57   :  { %899 = vmatpush3.bf16.msra.mxu0 %v896_v17  ;;  %933 = vmatprep.subr.bf16.mxu1 %v932_v22  ;;  %v263_v59 = vld [vmem:[#allocation8 + $0x18] sm:$0xff]  ;;  %v265_v62 = vld [vmem:[#allocation8 + $0x28] sm:$0xff]  ;;  %v266_v0 = vld [vmem:[#allocation8 + $0x30] sm:$0xff] }
  0x58   :  { %901 = vmatprep.subr.bf16.mxu0 %v900_v23  ;;  %v956_v60 = vpack.c.bf16 %v263_v59, %v262_v57  ;;  %v960_v63 = vpack.c.bf16 %v265_v62, %v264_v61  ;;  %v267_v1 = vld [vmem:[#allocation8 + $0x38] sm:$0xff]  ;;  %v268_v3 = vld [vmem:[#allocation8 + $0x40] sm:$0xff]  ;;  %v269_v4 = vld [vmem:[#allocation8 + $0x48] sm:$0xff] }
  0x59   :  { %v964_v2 = vpack.c.bf16 %v267_v1, %v266_v0  ;;  %v968_v5 = vpack.c.bf16 %v269_v4, %v268_v3  ;;  %v270_v6 = vld [vmem:[#allocation8 + $0x50] sm:$0xff]  ;;  %v271_v7 = vld [vmem:[#allocation8 + $0x58] sm:$0xff]  ;;  %v272_v9 = vld [vmem:[#allocation8 + $0x60] sm:$0xff] }
  0x5a   :  { %935 = vmatpush3.bf16.msra.mxu1 %v932_v22  ;;  %v972_v8 = vpack.c.bf16 %v271_v7, %v270_v6  ;;  %v273_v10 = vld [vmem:[#allocation8 + $0x68] sm:$0xff]  ;;  %v274_v12 = vld [vmem:[#allocation8 + $0x70] sm:$0xff]  ;;  %v275_v13 = vld [vmem:[#allocation8 + $0x78] sm:$0xff] }
  0x5b   :  { %903 = vmatpush3.bf16.msra.mxu0 %v900_v23  ;;  %937 = vmatprep.subr.bf16.mxu1 %v936_v29  ;;  %v976_v11 = vpack.c.bf16 %v273_v10, %v272_v9  ;;  %v980_v14 = vpack.c.bf16 %v275_v13, %v274_v12 }
  0x5c   :  { %905 = vmatprep.subr.bf16.mxu0 %v904_v30 }
  0x5e   :  { %939 = vmatpush3.bf16.msra.mxu1 %v936_v29 }
  0x5f   :  { %907 = vmatpush3.bf16.msra.mxu0 %v904_v30  ;;  %941 = vmatprep.subr.bf16.mxu1 %v940_v35 }
  0x60   :  { %909 = vmatprep.subr.bf16.mxu0 %v908_v36 }
  0x62   :  { %943 = vmatpush3.bf16.msra.mxu1 %v940_v35 }
  0x63   :  { %911 = vmatpush3.bf16.msra.mxu0 %v908_v36  ;;  %945 = vmatprep.subr.bf16.mxu1 %v944_v41 }
  0x64   :  { %913 = vmatprep.subr.bf16.mxu0 %v912_v42 }
  0x66   :  { %947 = vmatpush3.bf16.msra.mxu1 %v944_v41 }
  0x67   :  { %915 = vmatpush3.bf16.msra.mxu0 %v912_v42  ;;  %949 = vmatprep.subr.bf16.mxu1 %v948_v47 }
  0x68   :  { %917 = vmatprep.subr.bf16.mxu0 %v916_v48 }
  0x6a   :  { %951 = vmatpush3.bf16.msra.mxu1 %v948_v47 }
  0x6b   :  { %919 = vmatpush3.bf16.msra.mxu0 %v916_v48  ;;  %868 = vmatprep.subr.mxu1 %v1150_v50 }
  0x6c   :  { %953 = vmatprep.subr.bf16.mxu0 %v952_v58 }
  0x6d   :  { %831 = vmatmul.mubr.f32.vlgmr.msra.gmra.mrb[0].mxu1 %v77_v49 }
  0x6e   :  { %796 = vmatmul.mubr.f32.vlgmr.msra.gmra.mrb[0].mxu0 %v77_v49  ;;  %870 = vmatprep.mubr.msk.f32.mxu1 %vm1151_vm0, %v1150_v50 }
  0x6f   :  { %865 = vmatprep.mubr.f32.mxu0 %v76_v26  ;;  %955 = vmatpush3.bf16.msra.mxu0 %v952_v58 }
  0x70   :  { %957 = vmatprep.subr.bf16.mxu0 %v956_v60 }
  0x73   :  { %959 = vmatpush3.bf16.msra.mxu0 %v956_v60 }
  0x74   :  { %961 = vmatprep.subr.bf16.mxu0 %v960_v63 }
  0x77   :  { %963 = vmatpush3.bf16.msra.mxu0 %v960_v63 }
  0x78   :  { %965 = vmatprep.subr.bf16.mxu0 %v964_v2 }
  0x7b   :  { %967 = vmatpush3.bf16.msra.mxu0 %v964_v2 }
  0x7c   :  { %969 = vmatprep.subr.bf16.mxu0 %v968_v5 }
  0x7f   :  { %971 = vmatpush3.bf16.msra.mxu0 %v968_v5 }
  0x80   :  { %973 = vmatprep.subr.bf16.mxu0 %v972_v8 }
  0x83   :  { %975 = vmatpush3.bf16.msra.mxu0 %v972_v8 }
  0x84   :  { %977 = vmatprep.subr.bf16.mxu0 %v976_v11 }
  0x87   :  { %979 = vmatpush3.bf16.msra.mxu0 %v976_v11 }
  0x88   :  { %981 = vmatprep.subr.bf16.mxu0 %v980_v14 }
  0x8b   :  { %983 = vmatpush3.bf16.msra.mxu0 %v980_v14 }
  0x8e   :  { %866 = vmatmul.mubr.f32.vlgmr.msra.gmra.mrb[2].mxu0 %v77_v49 }
 0x140   :  { %v832_v51 = vpop.f32.mrb[0].mxu1 }
 0x141   :  { %v251_v52 = vpop.f32.mrb[1].mxu1  ;;  %v797_v53 = vpop.f32.mrb[0].mxu0 }
 0x142   :  { %869 = vmatpush3.xpose.msra.mxu1 %v251_v52  ;;  %v160_v54 = vpop.f32.mrb[1].mxu0 }
 0x143   :  { %873 = vmatprep.subr.mxu1 %v1150_v50 }
 0x145   :  { %871 = vmatmul.mubr.f32.vlgmr.msra.gmra.mrb[2].mxu1 %v160_v54 }
 0x146   :  { %874 = vmatpush3.xpose.msra.mxu1 %v832_v51  ;;  %875 = vmatprep.mubr.msk.f32.mxu1 %vm1151_vm0, %v1150_v50 }
 0x147   :  { %878 = vmatprep.subr.mxu1 %v1150_v50 }
 0x149   :  { %876 = vmatmul.mubr.f32.vlgmr.msra.gmra.mrb[4].mxu1 %v797_v53 }
 0x14a   :  { %880 = vmatprep.mubr.msk.f32.mxu1 %vm1151_vm0, %v1150_v50 }
 0x161   :  { %v867_v31 = vpop.f32.mrb[2].mxu0 }
 0x162   :  { %v342_v32 = vpop.f32.mrb[3].mxu0 }
 0x163   :  { %879 = vmatpush3.msra.mxu1 %v342_v32 }
 0x164   :  { %883 = vmatprep.subr.mxu1 %v1150_v50 }
 0x218   :  { %v417_v15 = vpop.f32.mrb[2].mxu1 }
 0x219   :  { %v872_v16 = vpop.f32.mrb[3].mxu1  ;;  %v492_v17 = vsel %vm491_vm1, %v417_v15, -inf }
 0x21a   :  { %493 = vmax.xlane.f32.xlu0 %v492_v17 }
 0x21c   :  { %v487_v18 = vpop.f32.mrb[4].mxu1 }
 0x21d   :  { %v877_v19 = vpop.f32.mrb[5].mxu1  ;;  %v495_v20 = vsel %vm491_vm1, %v487_v18, -inf }
 0x21e   :  { %496 = vmax.xlane.f32.xlu0 %v495_v20 }
 0x2a7   :  { %v494_v21 = vpop.xlane.xlu0 %493 }
 0x2a8   :  { %v498_v22 = vsub.f32 %v417_v15, %v494_v21 }
 0x2aa   :  { %v500_v23 = vmul.f32 1.442695, %v498_v22 }
 0x2ab   :  { %v497_v24 = vpop.xlane.xlu0 %496 }
 0x2ac   :  { %994 = vpow2.f32 %v500_v23  ;;  %v499_v25 = vsub.f32 %v487_v18, %v497_v24 }
 0x2ae   :  { %v502_v26 = vmul.f32 1.442695, %v499_v25 }
 0x2b0   :  { %996 = vpow2.f32 %v502_v26 }
 0x2b6   :  { %v995_v27 = vpop.eup %994 }
 0x2b7   :  { %v504_v28 = vsel %vm491_vm1, %v995_v27, 0.0 }
 0x2b8   :  { %505 = vadd.xlane.f32.xlu1 %v504_v28 }
 0x2ba   :  { %v997_v29 = vpop.eup %996 }
 0x2bb   :  { %v507_v30 = vsel %vm491_vm1, %v997_v29, 0.0 }
 0x2bc   :  { %508 = vadd.xlane.f32.xlu1 %v507_v30 }
 0x345   :  { %v506_v33 = vpop.xlane.xlu1 %505 }
 0x346   :  { %998 = vrcp.f32 %v506_v33 }
 0x349   :  { %v509_v34 = vpop.xlane.xlu1 %508 }
 0x34a   :  { %1000 = vrcp.f32 %v509_v34 }
 0x350   :  { %v999_v35 = vpop.eup %998 }
 0x351   :  { %v512_v36 = vmul.f32 %v999_v35, %v995_v27 }
 0x353   :  { %660 = vst.msk [vmem:[#allocation10] sm:$0xff] %vm491_vm1, %v512_v36  ;;  %881 = vmatmul.mubr.msk.f32.vlgmr.msra.gmra.mrb[6].mxu1 %vm491_vm1, %v512_v36 }
 0x354   :  { %v1001_v37 = vpop.eup %1000  ;;  %884 = vmatpush3.msra.mxu1 %v867_v31  ;;  %885 = vmatprep.mubr.msk.f32.mxu1 %vm1151_vm0, %v1150_v50 }
 0x355   :  { %v513_v38 = vmul.f32 %v1001_v37, %v997_v29 }
 0x357   :  { %661 = vst.msk [vmem:[#allocation10 + $0x8] sm:$0xff] %vm491_vm1, %v513_v38  ;;  %886 = vmatmul.mubr.msk.f32.vlgmr.msra.gmra.mrb[8].mxu1 %vm491_vm1, %v513_v38 }
 0x358   :  { %1101 = shalt.err (!%p1098_p8)
}
 0x359   :  { %s1102_s20 = scalar_lea.hbm %s1312_s4, 256 }
 0x35a   :  { %p1103_p9 = scmp.ne.s32.totalorder %s1312_s4, %s1102_s20  ;;  %p1106_p10 = scmp.lt.u32.totalorder %s1102_s20, %s1312_s4 }
 0x35c   :  { %p1108_p11 = pnand %p1106_p10, %p1103_p9 }
 0x35e   :  { %1111 = shalt.err (!%p1108_p11)
}
 0x35f   :  { %675 = dma.vmem_to_hbm [thread:$0]  %s670_s1, 256, %s1312_s4, [#allocation4], %s1146_s30, %s1146_s30, %s1147_s6  }
 0x360   :  { %s1153_s28 = smov [#allocation11]  }
 0x361   :  { %s681_s29 = sshll.u32 %s1153_s28, 4  ;;  %s682_s29 = int_to_ptr.vmem [resolvable:$true] %s681_s29 }
 0x362   :  { %s1112_s0 = scalar_lea.vmem %s682_s29, 256  ;;  %p1117_p13 = scmp.lt.s32.totalorder %s682_s29, %s682_s29 }
 0x363   :  { %p1113_p12 = scmp.ne.s32.totalorder %s682_s29, %s1112_s0  ;;  %p1118_p0 = scmp.lt.s32.totalorder %s1112_s0, %s1112_s0 }
 0x365   :  { %p1119_p1 = por %p1118_p0, %p1117_p13 }
 0x367   :  { %p1120_p2 = pnand %p1119_p1, %p1113_p12 }
 0x426   :  { %v583_v39 = vpop.f32.mrb[6].mxu1 }
 0x427   :  { %662 = vst [vmem:[#allocation11] sm:$0xff] %v583_v39  ;;  %v882_v40 = vpop.f32.mrb[7].mxu1 }
 0x42a   :  { %v656_v41 = vpop.f32.mrb[8].mxu1 }
 0x42b   :  { %663 = vst [vmem:[#allocation11 + $0x8] sm:$0xff] %v656_v41  ;;  %v887_v42 = vpop.f32.mrb[9].mxu1 }
 0x42c   :  { %1123 = shalt.err (!%p1120_p2)
}
 0x42d   :  { %s1124_s4 = scalar_lea.hbm %s1313_s5, 256 }
 0x42e   :  { %p1125_p3 = scmp.ne.s32.totalorder %s1313_s5, %s1124_s4  ;;  %p1128_p4 = scmp.lt.u32.totalorder %s1124_s4, %s1313_s5 }
 0x430   :  { %p1130_p5 = pnand %p1128_p4, %p1125_p3 }
 0x432   :  { %1133 = shalt.err (!%p1130_p5)
}
 0x433   :  { %687 = dma.vmem_to_hbm [thread:$0]  %s682_s29, 256, %s1313_s5, [#allocation12], %s1146_s30, %s1146_s30, %s1147_s6  }
 0x434   :  { %1140 = dma.done.wait [#allocation4], 256  }
 0x435   :  { %1141 = vsyncadd [#allocation4], 4294967040 }
 0x436   :  { %1142 = dma.done.wait [#allocation12], 256  }
 0x437   :  { %1143 = vsyncadd [#allocation12], 4294967040 }
 0x438   :  { %694 = vsyncpa [#allocation3], 1 }
 0x439   :  { %695 = vsyncpa [#allocation6], 1 }
 0x43a   :  { %696 = vsyncpa [#allocation9], 1 }
 0x43b   :  { %697 = vsyncpa [#allocation4], 1 }
 0x43c   :  { %698 = vsyncpa [#allocation12], 1 }

</bundles_post_ra>
